<compile_context>
chip_gen: v7x
topology: tpu7x:2x2x1
jax: 0.10.0
libtpu: 0.0.40
codegen_flags: <defaults>
</compile_context>

<pallas_src>
import functools

import jax
import jax.numpy as jnp
from jax.experimental import pallas as pl
from jax.experimental.pallas import tpu as pltpu


def _round_up(x, m):
    return ((x + m - 1) // m) * m


# Below this many MACs the pallas_call launch cost dominates; use a fused XLA dot.
_SMALL_PROBLEM_MACS = 1 << 21


def _linear_kernel(x_ref, w_ref, b_ref, o_ref):
    """One (TM, TN) output tile: o = x @ w + b with f32 MXU accumulation."""
    acc = jnp.dot(x_ref[...], w_ref[...], preferred_element_type=jnp.float32)
    o_ref[...] = (acc + b_ref[...]).astype(o_ref.dtype)


def prepare_meta_linear_params(weight, bias, dtype=jnp.float32):
    """One-time parameter prep (outside the per-call path).

    weight: (N, K) PyTorch layout, bias: (N,).
    Returns weight pre-transposed to (K, N) and bias as (1, N).  No padding is
    required: the kernel uses full-dim K/N blocks (or 128-multiple N column tiles
    with OOB-masked writeback).  Pass dtype=jnp.bfloat16 to store/stream the
    operands in bf16 (f32 accumulation is kept); default f32 preserves the
    module's exact numerics.
    """
    w_t = jnp.asarray(weight, dtype).T            # (K, N)
    b2 = jnp.asarray(bias, dtype).reshape(1, -1)  # (1, N)
    return w_t, b2


def _auto_block_n(b_rows, k, n, tm, itemsize):
    """Pick the N tile width.

    Keep the resident (K, TN) weight tile comfortably inside scoped VMEM (v7x has
    only 64 MiB physical VMEM / 32 MiB scoped default).  When the whole weight
    fits, use a single full-dim-N block (lane-dense, unmasked stores) unless the
    batch grid collapses to one step, in which case split N so a v7x megacore
    still has >= 2 parallel grid steps.
    """
    budget = 6 * 1024 * 1024
    if k * n * itemsize <= budget:
        if pl.cdiv(b_rows, tm) == 1 and n >= 256:
            return _round_up(pl.cdiv(n, 2), 128)
        return n
    tn = max(256, (budget // (k * itemsize)) // 256 * 256)
    return n if tn >= n else tn


@functools.partial(jax.jit, static_argnames=("tm", "tn", "single_buffer_params"))
def _meta_linear_pallas(x2, w_t, b2, *, tm, tn, single_buffer_params):
    b_rows, k = x2.shape
    n = w_t.shape[1]
    # N-tiles outer, batch-tiles inner: the (K, TN) weight/bias blocks have a constant
    # index along the inner batch sweep, so they are fetched once per N tile.
    grid = (pl.cdiv(n, tn), pl.cdiv(b_rows, tm))
    resident = dict(pipeline_mode=pl.Buffered(1)) if single_buffer_params else {}

    cost = pl.CostEstimate(
        flops=2 * b_rows * k * n,
        transcendentals=0,
        bytes_accessed=(x2.size * x2.dtype.itemsize
                        + w_t.size * w_t.dtype.itemsize
                        + b2.size * b2.dtype.itemsize
                        + b_rows * n * 4),
    )

    return pl.pallas_call(
        _linear_kernel,
        out_shape=jax.ShapeDtypeStruct((b_rows, n), jnp.float32),
        grid=grid,
        in_specs=[
            pl.BlockSpec((tm, k), lambda j, i: (i, 0)),               # x: batch tile, full K
            pl.BlockSpec((k, tn), lambda j, i: (0, j), **resident),   # weight: resident per N tile
            pl.BlockSpec((1, tn), lambda j, i: (0, j), **resident),   # bias
        ],
        out_specs=pl.BlockSpec((tm, tn), lambda j, i: (i, j)),
        compiler_params=pltpu.CompilerParams(
            dimension_semantics=("parallel", "parallel"),
            vmem_limit_bytes=32 * 1024 * 1024,
        ),
        cost_estimate=cost,
    )(x2, w_t, b2)


def meta_linear_forward(x, w_t, b2, *, block_m=512, block_n=None, force_pallas=False):
    """y = x @ weight.T + bias, supporting arbitrary leading dims like F.linear.

    x:   (..., K)
    w_t: (K, N) from prepare_meta_linear_params
    b2:  (1, N)
    """
    lead = x.shape[:-1]
    k = x.shape[-1]
    kw, n = w_t.shape
    assert k == kw, f"in_features mismatch: x has {k}, weight has {kw}"

    x2 = jnp.asarray(x, w_t.dtype).reshape(-1, k)
    b_rows = x2.shape[0]

    # Tiny layers: a fused XLA dot beats pallas_call fixed launch overhead.
    if not force_pallas and b_rows * k * n < _SMALL_PROBLEM_MACS:
        out = jnp.dot(x2, w_t, preferred_element_type=jnp.float32) + b2.astype(jnp.float32)
        return out.reshape(*lead, n)

    tm = min(block_m, _round_up(max(b_rows, 1), 8))
    if block_n is None:
        tn = _auto_block_n(b_rows, k, n, tm, jnp.dtype(w_t.dtype).itemsize)
    else:
        tn = block_n if block_n < n else n
        if tn < n and tn % 128 != 0:
            raise ValueError("block_n must be a multiple of 128 or >= out_features")

    try:
        out = _meta_linear_pallas(x2, w_t, b2, tm=tm, tn=tn, single_buffer_params=True)
    except Exception:
        # pl.Buffered(1) (single-buffered resident weight) not supported on this
        # JAX/Mosaic version; retry with default double buffering.
        out = _meta_linear_pallas(x2, w_t, b2, tm=tm, tn=tn, single_buffer_params=False)
    return out.reshape(*lead, n)


def meta_linear_reference(x, weight, bias):
    """Plain-JAX reference of F.linear for correctness checks."""
    return (jnp.matmul(x.astype(jnp.float32), weight.T.astype(jnp.float32))
            + bias.astype(jnp.float32))


if __name__ == "__main__":
    key = jax.random.PRNGKey(0)

    def make_case(case_key, lead, k, n):
        k_w, k_b, k_x = jax.random.split(case_key, 3)
        bound = 1.0 / (k ** 0.5)  # nn.Linear default init range
        weight = jax.random.uniform(k_w, (n, k), jnp.float32, -bound, bound)  # (out, in)
        bias = jax.random.uniform(k_b, (n,), jnp.float32, -bound, bound)
        x = jax.random.normal(k_x, (*lead, k), jnp.float32)
        return x, weight, bias

    # Deliberately non-lane-aligned sizes (like the model's 300->150 layers), covering:
    cases = [
        ((8,), 300, 150, dict(force_pallas=True)),                  # single tile, full-dim N (masked lane tail)
        ((2, 320), 300, 384, dict()),                               # multi batch-tile, natural Pallas dispatch
        ((64,), 300, 150, dict(force_pallas=True, block_n=128)),    # N tiling with a partial last column tile
        ((8,), 64, 384, dict(force_pallas=True)),                   # single batch step -> auto N split (v7x megacore)
        ((8,), 300, 150, dict()),                                   # small-problem XLA-dot dispatch path
    ]

    keys = jax.random.split(key, len(cases))
    for case_key, (lead, k, n, kwargs) in zip(keys, cases):
        x, weight, bias = make_case(case_key, lead, k, n)
        w_t, b2 = prepare_meta_linear_params(weight, bias)
        out = jax.block_until_ready(meta_linear_forward(x, w_t, b2, **kwargs))
        ref = meta_linear_reference(x, weight, bias)
        assert out.shape == ref.shape, (out.shape, ref.shape)
        err = jnp.max(jnp.abs(out - ref))
        assert jnp.allclose(out, ref, atol=2e-4, rtol=2e-4), (
            f"mismatch for lead={lead} K={k} N={n}: max abs err {err}")

    print("KERNEL_OK")
</pallas_src>

<mosaic_0001>
module attributes {stable_mosaic.version = 11 : i64} {
  func.func @_linear_kernel(%arg0: i32, %arg1: i32, %arg2: memref<8x300xf32, #tpu.memory_space<vmem>>, %arg3: memref<300x150xf32, #tpu.memory_space<vmem>>, %arg4: memref<1x150xf32, #tpu.memory_space<vmem>>, %arg5: memref<8x150xf32, #tpu.memory_space<vmem>>) attributes {dimension_semantics = [#tpu.dimension_semantics<parallel>, #tpu.dimension_semantics<parallel>], iteration_bounds = array<i64: 1, 1>, scalar_prefetch = 0 : i64, scratch_operands = 0 : i64, tpu.core_type = #tpu.core_type<tc>, window_params = [{transform_indices = @transform_0, window_bounds = array<i64: 8, 300>}, {pipeline_mode = #tpu.pipeline_mode<synchronous>, transform_indices = @transform_1, window_bounds = array<i64: 300, 150>}, {pipeline_mode = #tpu.pipeline_mode<synchronous>, transform_indices = @transform_2, window_bounds = array<i64: 1, 150>}, {transform_indices = @transform_3, window_bounds = array<i64: 8, 150>}]} {
    %c0 = arith.constant 0 : index
    %c0_0 = arith.constant 0 : index
    %0 = vector.load %arg2[%c0, %c0_0] : memref<8x300xf32, #tpu.memory_space<vmem>>, vector<8x300xf32>
    %c0_1 = arith.constant 0 : index
    %c0_2 = arith.constant 0 : index
    %1 = vector.load %arg3[%c0_1, %c0_2] : memref<300x150xf32, #tpu.memory_space<vmem>>, vector<300x150xf32>
    %cst = arith.constant dense<0.000000e+00> : vector<8x150xf32>
    %2 = tpu.matmul %0, %1, %cst {dimension_numbers = #tpu.dot_dimension_numbers<[1], [0], [0], [1], [0, 0, 1, 1], [], []>} : vector<8x300xf32>, vector<300x150xf32>, vector<8x150xf32> -> vector<8x150xf32>
    %c0_3 = arith.constant 0 : index
    %c0_4 = arith.constant 0 : index
    %3 = vector.load %arg4[%c0_3, %c0_4] : memref<1x150xf32, #tpu.memory_space<vmem>>, vector<1x150xf32>
    %4 = vector.broadcast %3 : vector<1x150xf32> to vector<8x150xf32>
    %5 = arith.addf %2, %4 : vector<8x150xf32>
    %c0_5 = arith.constant 0 : index
    %c0_6 = arith.constant 0 : index
    %6 = vector.load %arg5[%c0_5, %c0_6] : memref<8x150xf32, #tpu.memory_space<vmem>>, vector<8x150xf32>
    tpu.vector_store %arg5[%c0_5, %c0_6], %5 {strides = array<i32>} : memref<8x150xf32, #tpu.memory_space<vmem>>, vector<8x150xf32>,
    return
  }
  func.func @transform_0(%arg0: i32, %arg1: i32) -> (i32, i32) {
    %c0_i32 = arith.constant 0 : i32
    %c0_i32_0 = arith.constant 0 : i32
    return %arg1, %c0_i32 : i32, i32
  }
  func.func @transform_1(%arg0: i32, %arg1: i32) -> (i32, i32) {
    %c0_i32 = arith.constant 0 : i32
    %c0_i32_0 = arith.constant 0 : i32
    return %c0_i32, %arg0 : i32, i32
  }
  func.func @transform_2(%arg0: i32, %arg1: i32) -> (i32, i32) {
    %c0_i32 = arith.constant 0 : i32
    %c0_i32_0 = arith.constant 0 : i32
    return %c0_i32, %arg0 : i32, i32
  }
  func.func @transform_3(%arg0: i32, %arg1: i32) -> (i32, i32) {
    %c0_i32 = arith.constant 0 : i32
    return %arg1, %arg0 : i32, i32
  }
}

module attributes {stable_mosaic.version = 11 : i64} {
  func.func @_linear_kernel(%arg0: i32, %arg1: i32, %arg2: memref<8x300xf32, #tpu.memory_space<vmem>>, %arg3: memref<300x150xf32, #tpu.memory_space<vmem>>, %arg4: memref<1x150xf32, #tpu.memory_space<vmem>>, %arg5: memref<8x150xf32, #tpu.memory_space<vmem>>) attributes {dimension_semantics = [#tpu.dimension_semantics<parallel>, #tpu.dimension_semantics<parallel>], iteration_bounds = array<i64: 1, 1>, scalar_prefetch = 0 : i64, scratch_operands = 0 : i64, tpu.core_type = #tpu.core_type<tc>, window_params = [{transform_indices = @transform_0, window_bounds = array<i64: 8, 300>}, {transform_indices = @transform_1, window_bounds = array<i64: 300, 150>}, {transform_indices = @transform_2, window_bounds = array<i64: 1, 150>}, {transform_indices = @transform_3, window_bounds = array<i64: 8, 150>}]} {
    %c0 = arith.constant 0 : index
    %c0_0 = arith.constant 0 : index
    %0 = vector.load %arg2[%c0, %c0_0] : memref<8x300xf32, #tpu.memory_space<vmem>>, vector<8x300xf32>
    %c0_1 = arith.constant 0 : index
    %c0_2 = arith.constant 0 : index
    %1 = vector.load %arg3[%c0_1, %c0_2] : memref<300x150xf32, #tpu.memory_space<vmem>>, vector<300x150xf32>
    %cst = arith.constant dense<0.000000e+00> : vector<8x150xf32>
    %2 = tpu.matmul %0, %1, %cst {dimension_numbers = #tpu.dot_dimension_numbers<[1], [0], [0], [1], [0, 0, 1, 1], [], []>} : vector<8x300xf32>, vector<300x150xf32>, vector<8x150xf32> -> vector<8x150xf32>
    %c0_3 = arith.constant 0 : index
    %c0_4 = arith.constant 0 : index
    %3 = vector.load %arg4[%c0_3, %c0_4] : memref<1x150xf32, #tpu.memory_space<vmem>>, vector<1x150xf32>
    %4 = vector.broadcast %3 : vector<1x150xf32> to vector<8x150xf32>
    %5 = arith.addf %2, %4 : vector<8x150xf32>
    %c0_5 = arith.constant 0 : index
    %c0_6 = arith.constant 0 : index
    %6 = vector.load %arg5[%c0_5, %c0_6] : memref<8x150xf32, #tpu.memory_space<vmem>>, vector<8x150xf32>
    tpu.vector_store %arg5[%c0_5, %c0_6], %5 {strides = array<i32>} : memref<8x150xf32, #tpu.memory_space<vmem>>, vector<8x150xf32>,
    return
  }
  func.func @transform_0(%arg0: i32, %arg1: i32) -> (i32, i32) {
    %c0_i32 = arith.constant 0 : i32
    %c0_i32_0 = arith.constant 0 : i32
    return %arg1, %c0_i32 : i32, i32
  }
  func.func @transform_1(%arg0: i32, %arg1: i32) -> (i32, i32) {
    %c0_i32 = arith.constant 0 : i32
    %c0_i32_0 = arith.constant 0 : i32
    return %c0_i32, %arg0 : i32, i32
  }
  func.func @transform_2(%arg0: i32, %arg1: i32) -> (i32, i32) {
    %c0_i32 = arith.constant 0 : i32
    %c0_i32_0 = arith.constant 0 : i32
    return %c0_i32, %arg0 : i32, i32
  }
  func.func @transform_3(%arg0: i32, %arg1: i32) -> (i32, i32) {
    %c0_i32 = arith.constant 0 : i32
    return %arg1, %arg0 : i32, i32
  }
}

</mosaic_0001>

<bundles_post_ra>
// kernel: _meta_linear_pallas.1
= control target key start
LH: loop header
LB: loop body
LE: loop exit
PB: predicated region body
PF: predicated region fallthrough
CT: control target
= control target key end

     0   :  { %v388_v7 = vmov 0.0   ;;  %vm110_vm0 = vcmask 1043456   ;;  %vm389_vm1 = vmmov 1   ;;  %s672_s0 = inlined_call_operand.vmem [shape: f32[8,300], index: 0, kind: input, shape index: {}]   ;;  %s673_s1 = inlined_call_operand.vmem [shape: f32[300,150], index: 1, kind: input, shape index: {}]   ;;  %s674_s2 = inlined_call_operand.vmem [shape: f32[1,150], index: 2, kind: input, shape index: {}]   ;;  %s675_s3 = inlined_call_operand.hbm [shape: f32[8,150], index: 3, kind: output, shape index: {}]  }
   0x1   :  { %v19_v0 = vld [vmem:[%s673_s1 + $0x8] sm:$0xff]  ;;  %v21_v1 = vld [vmem:[%s673_s1 + $0x18] sm:$0xff]  ;;  %v18_v2 = vld [vmem:[%s673_s1] sm:$0xff]  ;;  %252 = vmatprep.mubr.f32.mxu0 %v388_v7 }
   0x2   :  { %v279_v3 = vpack.c.bf16 %v21_v1, %v19_v0  ;;  %v20_v4 = vld [vmem:[%s673_s1 + $0x10] sm:$0xff]  ;;  %v23_v5 = vld [vmem:[%s673_s1 + $0x28] sm:$0xff]  ;;  %v25_v6 = vld [vmem:[%s673_s1 + $0x38] sm:$0xff] }
   0x3   :  { %v281_v8 = vpack.c.bf16 %v20_v4, %v18_v2  ;;  %v283_v9 = vpack.c.bf16 %v25_v6, %v23_v5  ;;  %v22_v10 = vld [vmem:[%s673_s1 + $0x20] sm:$0xff]  ;;  %v24_v11 = vld [vmem:[%s673_s1 + $0x30] sm:$0xff]  ;;  %v27_v12 = vld [vmem:[%s673_s1 + $0x48] sm:$0xff] }
   0x4   :  { %280 = vmatprep.subr.bf16.mxu1 %v279_v3  ;;  %v29_v13 = vld [vmem:[%s673_s1 + $0x58] sm:$0xff]  ;;  %v285_v14 = vpack.c.bf16 %v24_v11, %v22_v10  ;;  %v26_v16 = vld [vmem:[%s673_s1 + $0x40] sm:$0xff]  ;;  %v28_v17 = vld [vmem:[%s673_s1 + $0x50] sm:$0xff] }
   0x5   :  { %282 = vmatpush1.bf16.msra.mxu1 %v281_v8  ;;  %v287_v15 = vpack.c.bf16 %v29_v13, %v27_v12  ;;  %v31_v18 = vld [vmem:[%s673_s1 + $0x68] sm:$0xff]  ;;  %v33_v19 = vld [vmem:[%s673_s1 + $0x78] sm:$0xff]  ;;  %v289_v20 = vpack.c.bf16 %v28_v17, %v26_v16  ;;  %v30_v22 = vld [vmem:[%s673_s1 + $0x60] sm:$0xff] }
   0x6   :  { %284 = vmatprep.subr.bf16.mxu1 %v283_v9  ;;  %v291_v21 = vpack.c.bf16 %v33_v19, %v31_v18  ;;  %v32_v23 = vld [vmem:[%s673_s1 + $0x70] sm:$0xff]  ;;  %v35_v24 = vld [vmem:[%s673_s1 + $0x88] sm:$0xff]  ;;  %v37_v25 = vld [vmem:[%s673_s1 + $0x98] sm:$0xff] }
   0x7   :  { %v293_v26 = vpack.c.bf16 %v32_v23, %v30_v22  ;;  %v295_v27 = vpack.c.bf16 %v37_v25, %v35_v24  ;;  %v34_v28 = vld [vmem:[%s673_s1 + $0x80] sm:$0xff]  ;;  %v36_v29 = vld [vmem:[%s673_s1 + $0x90] sm:$0xff]  ;;  %v39_v30 = vld [vmem:[%s673_s1 + $0xa8] sm:$0xff] }
   0x8   :  { %v41_v31 = vld [vmem:[%s673_s1 + $0xb8] sm:$0xff]  ;;  %v297_v32 = vpack.c.bf16 %v36_v29, %v34_v28  ;;  %v38_v34 = vld [vmem:[%s673_s1 + $0xa0] sm:$0xff]  ;;  %v40_v35 = vld [vmem:[%s673_s1 + $0xb0] sm:$0xff] }
   0x9   :  { %286 = vmatpush1.bf16.msra.mxu1 %v285_v14  ;;  %v299_v33 = vpack.c.bf16 %v41_v31, %v39_v30  ;;  %v43_v36 = vld [vmem:[%s673_s1 + $0xc8] sm:$0xff]  ;;  %v45_v37 = vld [vmem:[%s673_s1 + $0xd8] sm:$0xff]  ;;  %v82_v40 = vld [vmem:[%s673_s1 + $0x200] sm:$0xff]  ;;  %v301_v42 = vpack.c.bf16 %v40_v35, %v38_v34 }
   0xa   :  { %288 = vmatprep.subr.bf16.mxu1 %v287_v15  ;;  %v83_v38 = vld [vmem:[%s673_s1 + $0x208] sm:$0xff]  ;;  %v85_v39 = vld [vmem:[%s673_s1 + $0x218] sm:$0xff]  ;;  %v84_v41 = vld [vmem:[%s673_s1 + $0x210] sm:$0xff]  ;;  %v303_v47 = vpack.c.bf16 %v45_v37, %v43_v36 }
   0xb   :  { %v42_v43 = vld [vmem:[%s673_s1 + $0xc0] sm:$0xff]  ;;  %v44_v44 = vld [vmem:[%s673_s1 + $0xd0] sm:$0xff]  ;;  %v343_v45 = vpack.c.bf16 %v85_v39, %v83_v38  ;;  %v345_v46 = vpack.c.bf16 %v84_v41, %v82_v40  ;;  %v47_v48 = vld [vmem:[%s673_s1 + $0xe8] sm:$0xff] }
   0xc   :  { %v87_v49 = vld [vmem:[%s673_s1 + $0x228] sm:$0xff]  ;;  %v89_v50 = vld [vmem:[%s673_s1 + $0x238] sm:$0xff]  ;;  %v86_v53 = vld [vmem:[%s673_s1 + $0x220] sm:$0xff]  ;;  %v305_v58 = vpack.c.bf16 %v44_v44, %v42_v43 }
   0xd   :  { %290 = vmatpush1.bf16.msra.mxu1 %v289_v20  ;;  %v49_v51 = vld [vmem:[%s673_s1 + $0xf8] sm:$0xff]  ;;  %344 = vmatprep.subr.bf16.mxu0 %v343_v45  ;;  %v347_v52 = vpack.c.bf16 %v89_v50, %v87_v49  ;;  %v88_v54 = vld [vmem:[%s673_s1 + $0x230] sm:$0xff]  ;;  %v46_v55 = vld [vmem:[%s673_s1 + $0xe0] sm:$0xff] }
   0xe   :  { %292 = vmatprep.subr.bf16.mxu1 %v291_v21  ;;  %v48_v56 = vld [vmem:[%s673_s1 + $0xf0] sm:$0xff]  ;;  %346 = vmatpush1.bf16.msra.mxu0 %v345_v46  ;;  %v349_v57 = vpack.c.bf16 %v88_v54, %v86_v53  ;;  %v91_v59 = vld [vmem:[%s673_s1 + $0x248] sm:$0xff]  ;;  %v93_v60 = vld [vmem:[%s673_s1 + $0x258] sm:$0xf]  ;;  %v307_v62 = vpack.c.bf16 %v49_v51, %v47_v48 }
   0xf   :  { %348 = vmatprep.subr.bf16.mxu0 %v347_v52  ;;  %vm538_vm2 = vmpackc.low %vm110_vm0, %vm389_vm1  ;;  %v351_v63 = vpack.c.bf16 %v93_v60, %v91_v59  ;;  %v90_v0 = vld [vmem:[%s673_s1 + $0x240] sm:$0xff]  ;;  %v92_v1 = vld [vmem:[%s673_s1 + $0x250] sm:$0xf] }
  0x10   :  { %v16_v2 = vld [vmem:[%s672_s0 + $0x8] sm:$0xff]  ;;  %v53_v4 = vld [vmem:[%s673_s1 + $0x118] sm:$0xff]  ;;  %v354_v5 = vpack.c.bf16 %v92_v1, %v90_v0 }
  0x11   :  { %294 = vmatpush1.bf16.msra.mxu1 %v293_v26  ;;  %v51_v3 = vld [vmem:[%s673_s1 + $0x108] sm:$0xff]  ;;  %181 = vmatprep.mubr.f32.mxu1 %v16_v2 }
  0x12   :  { %296 = vmatprep.subr.bf16.mxu1 %v295_v27  ;;  %350 = vmatpush1.bf16.msra.mxu0 %v349_v57 }
  0x15   :  { %298 = vmatpush1.bf16.msra.mxu1 %v297_v32 }
  0x16   :  { %300 = vmatprep.subr.bf16.mxu1 %v299_v33 }
  0x19   :  { %302 = vmatpush1.bf16.msra.mxu1 %v301_v42 }
  0x1a   :  { %304 = vmatprep.subr.bf16.mxu1 %v303_v47 }
  0x1b   :  { %8 = vsyncpa [#allocation3], 0  ;;  %v309_v6 = vpack.c.bf16 %v48_v56, %v46_v55  ;;  %353 = vmatprep.subr.msk.bf16.mxu0 %vm538_vm2, %v351_v63  ;;  %v311_v7 = vpack.c.bf16 %v53_v4, %v51_v3  ;;  %v50_v8 = vld [vmem:[%s673_s1 + $0x100] sm:$0xff]  ;;  %v52_v9 = vld [vmem:[%s673_s1 + $0x110] sm:$0xff]  ;;  %vm106_vm3 = vcmask 359424   ;;  %v96_v57 = vlaneseq }
  0x1c   :  { %v55_v10 = vld [vmem:[%s673_s1 + $0x128] sm:$0xff]  ;;  %v57_v11 = vld [vmem:[%s673_s1 + $0x138] sm:$0xff]  ;;  %356 = vmatpush1.bf16.msk.msra.mxu0 %vm538_vm2, %v354_v5  ;;  %v17_v12 = vld [vmem:[%s672_s0 + $0x10] sm:$0xff]  ;;  %v313_v13 = vpack.c.bf16 %v52_v9, %v50_v8  ;;  %vm260_vm4 = vcmask 179200  }
  0x1d   :  { %306 = vmatpush1.bf16.msra.mxu1 %v305_v58  ;;  %v315_v14 = vpack.c.bf16 %v57_v11, %v55_v10  ;;  %v54_v15 = vld [vmem:[%s673_s1 + $0x120] sm:$0xff]  ;;  %v56_v16 = vld [vmem:[%s673_s1 + $0x130] sm:$0xff]  ;;  %v59_v17 = vld [vmem:[%s673_s1 + $0x148] sm:$0xff]  ;;  %v97_v58 = vshrl.u32 %v96_v57, 7 }
  0x1e   :  { %308 = vmatprep.subr.bf16.mxu1 %v307_v62  ;;  %v61_v18 = vld [vmem:[%s673_s1 + $0x158] sm:$0xff]  ;;  %v317_v19 = vpack.c.bf16 %v56_v16, %v54_v15  ;;  %v58_v21 = vld [vmem:[%s673_s1 + $0x140] sm:$0xff]  ;;  %v60_v22 = vld [vmem:[%s673_s1 + $0x150] sm:$0xff] }
  0x1f   :  { %278 = vmatmul.mubr.msk.f32.vlgmr.msra.gmra.mrb[0].mxu0 %vm106_vm3, %v17_v12  ;;  %v319_v20 = vpack.c.bf16 %v61_v18, %v59_v17  ;;  %v63_v23 = vld [vmem:[%s673_s1 + $0x168] sm:$0xff]  ;;  %v65_v24 = vld [vmem:[%s673_s1 + $0x178] sm:$0xff]  ;;  %v321_v25 = vpack.c.bf16 %v60_v22, %v58_v21  ;;  %v62_v27 = vld [vmem:[%s673_s1 + $0x160] sm:$0xff]  ;;  %v98_v59 = vsub.s32 0, %v97_v58  ;;  %v102_v61 = vsub.s32 1, %v97_v58 }
  0x20   :  { %v323_v26 = vpack.c.bf16 %v65_v24, %v63_v23  ;;  %v64_v28 = vld [vmem:[%s673_s1 + $0x170] sm:$0xff]  ;;  %v67_v29 = vld [vmem:[%s673_s1 + $0x188] sm:$0xff]  ;;  %v69_v30 = vld [vmem:[%s673_s1 + $0x198] sm:$0xff] }
  0x21   :  { %310 = vmatpush1.bf16.msra.mxu1 %v309_v6  ;;  %v325_v31 = vpack.c.bf16 %v64_v28, %v62_v27  ;;  %v327_v32 = vpack.c.bf16 %v69_v30, %v67_v29  ;;  %v66_v33 = vld [vmem:[%s673_s1 + $0x180] sm:$0xff]  ;;  %v68_v34 = vld [vmem:[%s673_s1 + $0x190] sm:$0xff]  ;;  %v71_v35 = vld [vmem:[%s673_s1 + $0x1a8] sm:$0xff] }
  0x22   :  { %312 = vmatprep.subr.bf16.mxu1 %v311_v7  ;;  %v73_v36 = vld [vmem:[%s673_s1 + $0x1b8] sm:$0xff]  ;;  %v329_v37 = vpack.c.bf16 %v68_v34, %v66_v33  ;;  %v70_v39 = vld [vmem:[%s673_s1 + $0x1a0] sm:$0xff]  ;;  %v72_v40 = vld [vmem:[%s673_s1 + $0x1b0] sm:$0xff] }
  0x23   :  { %v331_v38 = vpack.c.bf16 %v73_v36, %v71_v35  ;;  %v75_v41 = vld [vmem:[%s673_s1 + $0x1c8] sm:$0xff]  ;;  %v77_v42 = vld [vmem:[%s673_s1 + $0x1d8] sm:$0xff]  ;;  %v333_v43 = vpack.c.bf16 %v72_v40, %v70_v39  ;;  %v74_v45 = vld [vmem:[%s673_s1 + $0x1c0] sm:$0xff] }
  0x24   :  { %v335_v44 = vpack.c.bf16 %v77_v42, %v75_v41  ;;  %v76_v46 = vld [vmem:[%s673_s1 + $0x1d0] sm:$0xff]  ;;  %v79_v47 = vld [vmem:[%s673_s1 + $0x1e8] sm:$0xff]  ;;  %v81_v48 = vld [vmem:[%s673_s1 + $0x1f8] sm:$0xff] }
  0x25   :  { %314 = vmatpush1.bf16.msra.mxu1 %v313_v13  ;;  %v337_v49 = vpack.c.bf16 %v76_v46, %v74_v45  ;;  %v339_v50 = vpack.c.bf16 %v81_v48, %v79_v47  ;;  %v78_v51 = vld [vmem:[%s673_s1 + $0x1e0] sm:$0xff]  ;;  %v80_v52 = vld [vmem:[%s673_s1 + $0x1f0] sm:$0xff]  ;;  %s390_s1 = smov [#allocation2]  }
  0x26   :  { %316 = vmatprep.subr.bf16.mxu1 %v315_v14  ;;  %v341_v53 = vpack.c.bf16 %v80_v52, %v78_v51  ;;  %v15_v54 = vld [vmem:[%s672_s0] sm:$0xff]  ;;  %s268_s10 = sshll.u32 %s390_s1, 4  ;;  %s269_s10 = int_to_ptr.vmem [resolvable:$true] %s268_s10 }
  0x27   :  { %v94_v60 = vld [vmem:[%s674_s2] sm:$0x3]  ;;  %s364_s0 = scalar_lea.vmem %s269_s10, 256  ;;  %p369_p1 = scmp.lt.s32.totalorder %s269_s10, %s269_s10 }
  0x28   :  { %v99_v62 = vrot.slane %v94_v60, %v98_v59  ;;  %v103_v63 = vrot.slane %v94_v60, %v102_v61  ;;  %p365_p0 = scmp.ne.s32.totalorder %s269_s10, %s364_s0  ;;  %p370_p2 = scmp.lt.s32.totalorder %s364_s0, %s364_s0 }
  0x29   :  { %318 = vmatpush1.bf16.msra.mxu1 %v317_v19 }
  0x2a   :  { %320 = vmatprep.subr.bf16.mxu1 %v319_v20  ;;  %p371_p3 = por %p370_p2, %p369_p1 }
  0x2c   :  { %p372_p4 = pnand %p371_p3, %p365_p0 }
  0x2d   :  { %322 = vmatpush1.bf16.msra.mxu1 %v321_v25 }
  0x2e   :  { %324 = vmatprep.subr.bf16.mxu1 %v323_v26 }
  0x31   :  { %326 = vmatpush1.bf16.msra.mxu1 %v325_v31 }
  0x32   :  { %328 = vmatprep.subr.bf16.mxu1 %v327_v32 }
  0x35   :  { %330 = vmatpush1.bf16.msra.mxu1 %v329_v37 }
  0x36   :  { %332 = vmatprep.subr.bf16.mxu1 %v331_v38 }
  0x39   :  { %334 = vmatpush1.bf16.msra.mxu1 %v333_v43 }
  0x3a   :  { %336 = vmatprep.subr.bf16.mxu1 %v335_v44 }
  0x3d   :  { %338 = vmatpush1.bf16.msra.mxu1 %v337_v49 }
  0x3e   :  { %340 = vmatprep.subr.bf16.mxu1 %v339_v50 }
  0x41   :  { %342 = vmatpush1.bf16.msra.mxu1 %v341_v53 }
  0x44   :  { %182 = vmatmul.mubr.f32.vlgmr.msra.gmra.mrb[0].mxu1 %v15_v54 }
  0xf2   :  { %v254_v55 = vpop.f32.mrb[0].mxu0 }
  0xf3   :  { %v256_v56 = vpop.f32.mrb[1].mxu0 }
 0x117   :  { %v183_v0 = vpop.f32.mrb[0].mxu1 }
 0x118   :  { %v184_v1 = vadd.f32 %v183_v0, %v99_v62  ;;  %v185_v2 = vpop.f32.mrb[1].mxu1 }
 0x119   :  { %v186_v3 = vadd.f32 %v185_v2, %v103_v63 }
 0x11a   :  { %v255_v4 = vadd.f32 %v254_v55, %v184_v1 }
 0x11b   :  { %v257_v5 = vadd.f32 %v256_v56, %v186_v3 }
 0x11c   :  { %259 = vst [vmem:[#allocation2] sm:$0xff] %v255_v4 }
 0x11d   :  { %261 = vst.msk [vmem:[#allocation2 + $0x8] sm:$0xff] %vm260_vm4, %v257_v5 }
 0x11e   :  { %375 = shalt.err (!%p372_p4)
}
 0x11f   :  { %s376_s12 = scalar_lea.hbm %s675_s3, 256 }
 0x120   :  { %p377_p5 = scmp.ne.s32.totalorder %s675_s3, %s376_s12  ;;  %p380_p6 = scmp.lt.u32.totalorder %s376_s12, %s675_s3 }
 0x122   :  { %p382_p7 = pnand %p380_p6, %p377_p5 }
 0x124   :  { %385 = shalt.err (!%p382_p7)
}
 0x125   :  { %271 = dma.vmem_to_hbm [thread:$0]  %s269_s10, 256, %s675_s3, [#allocation3]  }
 0x126   :  { %386 = dma.done.wait [#allocation3], 256  }
 0x127   :  { %387 = vsyncadd [#allocation3], 4294967040 }
 0x128   :  { %275 = vsyncpa [#allocation3], 1 }

// kernel: _meta_linear_pallas.1
= control target key start
LH: loop header
LB: loop body
LE: loop exit
PB: predicated region body
PF: predicated region fallthrough
CT: control target
= control target key end

     0   :  { %v388_v7 = vmov 0.0   ;;  %vm110_vm0 = vcmask 1043456   ;;  %vm389_vm1 = vmmov 1   ;;  %s672_s0 = inlined_call_operand.vmem [shape: f32[8,300], index: 0, kind: input, shape index: {}]   ;;  %s673_s1 = inlined_call_operand.vmem [shape: f32[300,150], index: 1, kind: input, shape index: {}]   ;;  %s674_s2 = inlined_call_operand.vmem [shape: f32[1,150], index: 2, kind: input, shape index: {}]   ;;  %s675_s3 = inlined_call_operand.hbm [shape: f32[8,150], index: 3, kind: output, shape index: {}]  }
   0x1   :  { %v19_v0 = vld [vmem:[%s673_s1 + $0x8] sm:$0xff]  ;;  %v21_v1 = vld [vmem:[%s673_s1 + $0x18] sm:$0xff]  ;;  %v18_v2 = vld [vmem:[%s673_s1] sm:$0xff]  ;;  %252 = vmatprep.mubr.f32.mxu0 %v388_v7 }
   0x2   :  { %v279_v3 = vpack.c.bf16 %v21_v1, %v19_v0  ;;  %v20_v4 = vld [vmem:[%s673_s1 + $0x10] sm:$0xff]  ;;  %v23_v5 = vld [vmem:[%s673_s1 + $0x28] sm:$0xff]  ;;  %v25_v6 = vld [vmem:[%s673_s1 + $0x38] sm:$0xff] }
   0x3   :  { %v281_v8 = vpack.c.bf16 %v20_v4, %v18_v2  ;;  %v283_v9 = vpack.c.bf16 %v25_v6, %v23_v5  ;;  %v22_v10 = vld [vmem:[%s673_s1 + $0x20] sm:$0xff]  ;;  %v24_v11 = vld [vmem:[%s673_s1 + $0x30] sm:$0xff]  ;;  %v27_v12 = vld [vmem:[%s673_s1 + $0x48] sm:$0xff] }
   0x4   :  { %280 = vmatprep.subr.bf16.mxu1 %v279_v3  ;;  %v29_v13 = vld [vmem:[%s673_s1 + $0x58] sm:$0xff]  ;;  %v285_v14 = vpack.c.bf16 %v24_v11, %v22_v10  ;;  %v26_v16 = vld [vmem:[%s673_s1 + $0x40] sm:$0xff]  ;;  %v28_v17 = vld [vmem:[%s673_s1 + $0x50] sm:$0xff] }
   0x5   :  { %282 = vmatpush1.bf16.msra.mxu1 %v281_v8  ;;  %v287_v15 = vpack.c.bf16 %v29_v13, %v27_v12  ;;  %v31_v18 = vld [vmem:[%s673_s1 + $0x68] sm:$0xff]  ;;  %v33_v19 = vld [vmem:[%s673_s1 + $0x78] sm:$0xff]  ;;  %v289_v20 = vpack.c.bf16 %v28_v17, %v26_v16  ;;  %v30_v22 = vld [vmem:[%s673_s1 + $0x60] sm:$0xff] }
   0x6   :  { %284 = vmatprep.subr.bf16.mxu1 %v283_v9  ;;  %v291_v21 = vpack.c.bf16 %v33_v19, %v31_v18  ;;  %v32_v23 = vld [vmem:[%s673_s1 + $0x70] sm:$0xff]  ;;  %v35_v24 = vld [vmem:[%s673_s1 + $0x88] sm:$0xff]  ;;  %v37_v25 = vld [vmem:[%s673_s1 + $0x98] sm:$0xff] }
   0x7   :  { %v293_v26 = vpack.c.bf16 %v32_v23, %v30_v22  ;;  %v295_v27 = vpack.c.bf16 %v37_v25, %v35_v24  ;;  %v34_v28 = vld [vmem:[%s673_s1 + $0x80] sm:$0xff]  ;;  %v36_v29 = vld [vmem:[%s673_s1 + $0x90] sm:$0xff]  ;;  %v39_v30 = vld [vmem:[%s673_s1 + $0xa8] sm:$0xff] }
   0x8   :  { %v41_v31 = vld [vmem:[%s673_s1 + $0xb8] sm:$0xff]  ;;  %v297_v32 = vpack.c.bf16 %v36_v29, %v34_v28  ;;  %v38_v34 = vld [vmem:[%s673_s1 + $0xa0] sm:$0xff]  ;;  %v40_v35 = vld [vmem:[%s673_s1 + $0xb0] sm:$0xff] }
   0x9   :  { %286 = vmatpush1.bf16.msra.mxu1 %v285_v14  ;;  %v299_v33 = vpack.c.bf16 %v41_v31, %v39_v30  ;;  %v43_v36 = vld [vmem:[%s673_s1 + $0xc8] sm:$0xff]  ;;  %v45_v37 = vld [vmem:[%s673_s1 + $0xd8] sm:$0xff]  ;;  %v82_v40 = vld [vmem:[%s673_s1 + $0x200] sm:$0xff]  ;;  %v301_v42 = vpack.c.bf16 %v40_v35, %v38_v34 }
   0xa   :  { %288 = vmatprep.subr.bf16.mxu1 %v287_v15  ;;  %v83_v38 = vld [vmem:[%s673_s1 + $0x208] sm:$0xff]  ;;  %v85_v39 = vld [vmem:[%s673_s1 + $0x218] sm:$0xff]  ;;  %v84_v41 = vld [vmem:[%s673_s1 + $0x210] sm:$0xff]  ;;  %v303_v47 = vpack.c.bf16 %v45_v37, %v43_v36 }
   0xb   :  { %v42_v43 = vld [vmem:[%s673_s1 + $0xc0] sm:$0xff]  ;;  %v44_v44 = vld [vmem:[%s673_s1 + $0xd0] sm:$0xff]  ;;  %v343_v45 = vpack.c.bf16 %v85_v39, %v83_v38  ;;  %v345_v46 = vpack.c.bf16 %v84_v41, %v82_v40  ;;  %v47_v48 = vld [vmem:[%s673_s1 + $0xe8] sm:$0xff] }
   0xc   :  { %v87_v49 = vld [vmem:[%s673_s1 + $0x228] sm:$0xff]  ;;  %v89_v50 = vld [vmem:[%s673_s1 + $0x238] sm:$0xff]  ;;  %v86_v53 = vld [vmem:[%s673_s1 + $0x220] sm:$0xff]  ;;  %v305_v58 = vpack.c.bf16 %v44_v44, %v42_v43 }
   0xd   :  { %290 = vmatpush1.bf16.msra.mxu1 %v289_v20  ;;  %v49_v51 = vld [vmem:[%s673_s1 + $0xf8] sm:$0xff]  ;;  %344 = vmatprep.subr.bf16.mxu0 %v343_v45  ;;  %v347_v52 = vpack.c.bf16 %v89_v50, %v87_v49  ;;  %v88_v54 = vld [vmem:[%s673_s1 + $0x230] sm:$0xff]  ;;  %v46_v55 = vld [vmem:[%s673_s1 + $0xe0] sm:$0xff] }
   0xe   :  { %292 = vmatprep.subr.bf16.mxu1 %v291_v21  ;;  %v48_v56 = vld [vmem:[%s673_s1 + $0xf0] sm:$0xff]  ;;  %346 = vmatpush1.bf16.msra.mxu0 %v345_v46  ;;  %v349_v57 = vpack.c.bf16 %v88_v54, %v86_v53  ;;  %v91_v59 = vld [vmem:[%s673_s1 + $0x248] sm:$0xff]  ;;  %v93_v60 = vld [vmem:[%s673_s1 + $0x258] sm:$0xf]  ;;  %v307_v62 = vpack.c.bf16 %v49_v51, %v47_v48 }
   0xf   :  { %348 = vmatprep.subr.bf16.mxu0 %v347_v52  ;;  %vm538_vm2 = vmpackc.low %vm110_vm0, %vm389_vm1  ;;  %v351_v63 = vpack.c.bf16 %v93_v60, %v91_v59  ;;  %v90_v0 = vld [vmem:[%s673_s1 + $0x240] sm:$0xff]  ;;  %v92_v1 = vld [vmem:[%s673_s1 + $0x250] sm:$0xf] }
  0x10   :  { %v16_v2 = vld [vmem:[%s672_s0 + $0x8] sm:$0xff]  ;;  %v53_v4 = vld [vmem:[%s673_s1 + $0x118] sm:$0xff]  ;;  %v354_v5 = vpack.c.bf16 %v92_v1, %v90_v0 }
  0x11   :  { %294 = vmatpush1.bf16.msra.mxu1 %v293_v26  ;;  %v51_v3 = vld [vmem:[%s673_s1 + $0x108] sm:$0xff]  ;;  %181 = vmatprep.mubr.f32.mxu1 %v16_v2 }
  0x12   :  { %296 = vmatprep.subr.bf16.mxu1 %v295_v27  ;;  %350 = vmatpush1.bf16.msra.mxu0 %v349_v57 }
  0x15   :  { %298 = vmatpush1.bf16.msra.mxu1 %v297_v32 }
  0x16   :  { %300 = vmatprep.subr.bf16.mxu1 %v299_v33 }
  0x19   :  { %302 = vmatpush1.bf16.msra.mxu1 %v301_v42 }
  0x1a   :  { %304 = vmatprep.subr.bf16.mxu1 %v303_v47 }
  0x1b   :  { %8 = vsyncpa [#allocation3], 0  ;;  %v309_v6 = vpack.c.bf16 %v48_v56, %v46_v55  ;;  %353 = vmatprep.subr.msk.bf16.mxu0 %vm538_vm2, %v351_v63  ;;  %v311_v7 = vpack.c.bf16 %v53_v4, %v51_v3  ;;  %v50_v8 = vld [vmem:[%s673_s1 + $0x100] sm:$0xff]  ;;  %v52_v9 = vld [vmem:[%s673_s1 + $0x110] sm:$0xff]  ;;  %vm106_vm3 = vcmask 359424   ;;  %v96_v57 = vlaneseq }
  0x1c   :  { %v55_v10 = vld [vmem:[%s673_s1 + $0x128] sm:$0xff]  ;;  %v57_v11 = vld [vmem:[%s673_s1 + $0x138] sm:$0xff]  ;;  %356 = vmatpush1.bf16.msk.msra.mxu0 %vm538_vm2, %v354_v5  ;;  %v17_v12 = vld [vmem:[%s672_s0 + $0x10] sm:$0xff]  ;;  %v313_v13 = vpack.c.bf16 %v52_v9, %v50_v8  ;;  %vm260_vm4 = vcmask 179200  }
  0x1d   :  { %306 = vmatpush1.bf16.msra.mxu1 %v305_v58  ;;  %v315_v14 = vpack.c.bf16 %v57_v11, %v55_v10  ;;  %v54_v15 = vld [vmem:[%s673_s1 + $0x120] sm:$0xff]  ;;  %v56_v16 = vld [vmem:[%s673_s1 + $0x130] sm:$0xff]  ;;  %v59_v17 = vld [vmem:[%s673_s1 + $0x148] sm:$0xff]  ;;  %v97_v58 = vshrl.u32 %v96_v57, 7 }
  0x1e   :  { %308 = vmatprep.subr.bf16.mxu1 %v307_v62  ;;  %v61_v18 = vld [vmem:[%s673_s1 + $0x158] sm:$0xff]  ;;  %v317_v19 = vpack.c.bf16 %v56_v16, %v54_v15  ;;  %v58_v21 = vld [vmem:[%s673_s1 + $0x140] sm:$0xff]  ;;  %v60_v22 = vld [vmem:[%s673_s1 + $0x150] sm:$0xff] }
  0x1f   :  { %278 = vmatmul.mubr.msk.f32.vlgmr.msra.gmra.mrb[0].mxu0 %vm106_vm3, %v17_v12  ;;  %v319_v20 = vpack.c.bf16 %v61_v18, %v59_v17  ;;  %v63_v23 = vld [vmem:[%s673_s1 + $0x168] sm:$0xff]  ;;  %v65_v24 = vld [vmem:[%s673_s1 + $0x178] sm:$0xff]  ;;  %v321_v25 = vpack.c.bf16 %v60_v22, %v58_v21  ;;  %v62_v27 = vld [vmem:[%s673_s1 + $0x160] sm:$0xff]  ;;  %v98_v59 = vsub.s32 0, %v97_v58  ;;  %v102_v61 = vsub.s32 1, %v97_v58 }
  0x20   :  { %v323_v26 = vpack.c.bf16 %v65_v24, %v63_v23  ;;  %v64_v28 = vld [vmem:[%s673_s1 + $0x170] sm:$0xff]  ;;  %v67_v29 = vld [vmem:[%s673_s1 + $0x188] sm:$0xff]  ;;  %v69_v30 = vld [vmem:[%s673_s1 + $0x198] sm:$0xff] }
  0x21   :  { %310 = vmatpush1.bf16.msra.mxu1 %v309_v6  ;;  %v325_v31 = vpack.c.bf16 %v64_v28, %v62_v27  ;;  %v327_v32 = vpack.c.bf16 %v69_v30, %v67_v29  ;;  %v66_v33 = vld [vmem:[%s673_s1 + $0x180] sm:$0xff]  ;;  %v68_v34 = vld [vmem:[%s673_s1 + $0x190] sm:$0xff]  ;;  %v71_v35 = vld [vmem:[%s673_s1 + $0x1a8] sm:$0xff] }
  0x22   :  { %312 = vmatprep.subr.bf16.mxu1 %v311_v7  ;;  %v73_v36 = vld [vmem:[%s673_s1 + $0x1b8] sm:$0xff]  ;;  %v329_v37 = vpack.c.bf16 %v68_v34, %v66_v33  ;;  %v70_v39 = vld [vmem:[%s673_s1 + $0x1a0] sm:$0xff]  ;;  %v72_v40 = vld [vmem:[%s673_s1 + $0x1b0] sm:$0xff] }
  0x23   :  { %v331_v38 = vpack.c.bf16 %v73_v36, %v71_v35  ;;  %v75_v41 = vld [vmem:[%s673_s1 + $0x1c8] sm:$0xff]  ;;  %v77_v42 = vld [vmem:[%s673_s1 + $0x1d8] sm:$0xff]  ;;  %v333_v43 = vpack.c.bf16 %v72_v40, %v70_v39  ;;  %v74_v45 = vld [vmem:[%s673_s1 + $0x1c0] sm:$0xff] }
  0x24   :  { %v335_v44 = vpack.c.bf16 %v77_v42, %v75_v41  ;;  %v76_v46 = vld [vmem:[%s673_s1 + $0x1d0] sm:$0xff]  ;;  %v79_v47 = vld [vmem:[%s673_s1 + $0x1e8] sm:$0xff]  ;;  %v81_v48 = vld [vmem:[%s673_s1 + $0x1f8] sm:$0xff] }
  0x25   :  { %314 = vmatpush1.bf16.msra.mxu1 %v313_v13  ;;  %v337_v49 = vpack.c.bf16 %v76_v46, %v74_v45  ;;  %v339_v50 = vpack.c.bf16 %v81_v48, %v79_v47  ;;  %v78_v51 = vld [vmem:[%s673_s1 + $0x1e0] sm:$0xff]  ;;  %v80_v52 = vld [vmem:[%s673_s1 + $0x1f0] sm:$0xff]  ;;  %s390_s1 = smov [#allocation2]  }
  0x26   :  { %316 = vmatprep.subr.bf16.mxu1 %v315_v14  ;;  %v341_v53 = vpack.c.bf16 %v80_v52, %v78_v51  ;;  %v15_v54 = vld [vmem:[%s672_s0] sm:$0xff]  ;;  %s268_s10 = sshll.u32 %s390_s1, 4  ;;  %s269_s10 = int_to_ptr.vmem [resolvable:$true] %s268_s10 }
  0x27   :  { %v94_v60 = vld [vmem:[%s674_s2] sm:$0x3]  ;;  %s364_s0 = scalar_lea.vmem %s269_s10, 256  ;;  %p369_p1 = scmp.lt.s32.totalorder %s269_s10, %s269_s10 }
  0x28   :  { %v99_v62 = vrot.slane %v94_v60, %v98_v59  ;;  %v103_v63 = vrot.slane %v94_v60, %v102_v61  ;;  %p365_p0 = scmp.ne.s32.totalorder %s269_s10, %s364_s0  ;;  %p370_p2 = scmp.lt.s32.totalorder %s364_s0, %s364_s0 }
  0x29   :  { %318 = vmatpush1.bf16.msra.mxu1 %v317_v19 }
  0x2a   :  { %320 = vmatprep.subr.bf16.mxu1 %v319_v20  ;;  %p371_p3 = por %p370_p2, %p369_p1 }
  0x2c   :  { %p372_p4 = pnand %p371_p3, %p365_p0 }
  0x2d   :  { %322 = vmatpush1.bf16.msra.mxu1 %v321_v25 }
  0x2e   :  { %324 = vmatprep.subr.bf16.mxu1 %v323_v26 }
  0x31   :  { %326 = vmatpush1.bf16.msra.mxu1 %v325_v31 }
  0x32   :  { %328 = vmatprep.subr.bf16.mxu1 %v327_v32 }
  0x35   :  { %330 = vmatpush1.bf16.msra.mxu1 %v329_v37 }
  0x36   :  { %332 = vmatprep.subr.bf16.mxu1 %v331_v38 }
  0x39   :  { %334 = vmatpush1.bf16.msra.mxu1 %v333_v43 }
  0x3a   :  { %336 = vmatprep.subr.bf16.mxu1 %v335_v44 }
  0x3d   :  { %338 = vmatpush1.bf16.msra.mxu1 %v337_v49 }
  0x3e   :  { %340 = vmatprep.subr.bf16.mxu1 %v339_v50 }
  0x41   :  { %342 = vmatpush1.bf16.msra.mxu1 %v341_v53 }
  0x44   :  { %182 = vmatmul.mubr.f32.vlgmr.msra.gmra.mrb[0].mxu1 %v15_v54 }
  0xf2   :  { %v254_v55 = vpop.f32.mrb[0].mxu0 }
  0xf3   :  { %v256_v56 = vpop.f32.mrb[1].mxu0 }
 0x117   :  { %v183_v0 = vpop.f32.mrb[0].mxu1 }
 0x118   :  { %v184_v1 = vadd.f32 %v183_v0, %v99_v62  ;;  %v185_v2 = vpop.f32.mrb[1].mxu1 }
 0x119   :  { %v186_v3 = vadd.f32 %v185_v2, %v103_v63 }
 0x11a   :  { %v255_v4 = vadd.f32 %v254_v55, %v184_v1 }
 0x11b   :  { %v257_v5 = vadd.f32 %v256_v56, %v186_v3 }
 0x11c   :  { %259 = vst [vmem:[#allocation2] sm:$0xff] %v255_v4 }
 0x11d   :  { %261 = vst.msk [vmem:[#allocation2 + $0x8] sm:$0xff] %vm260_vm4, %v257_v5 }
 0x11e   :  { %375 = shalt.err (!%p372_p4)
}
 0x11f   :  { %s376_s12 = scalar_lea.hbm %s675_s3, 256 }
 0x120   :  { %p377_p5 = scmp.ne.s32.totalorder %s675_s3, %s376_s12  ;;  %p380_p6 = scmp.lt.u32.totalorder %s376_s12, %s675_s3 }
 0x122   :  { %p382_p7 = pnand %p380_p6, %p377_p5 }
 0x124   :  { %385 = shalt.err (!%p382_p7)
}
 0x125   :  { %271 = dma.vmem_to_hbm [thread:$0]  %s269_s10, 256, %s675_s3, [#allocation3]  }
 0x126   :  { %386 = dma.done.wait [#allocation3], 256  }
 0x127   :  { %387 = vsyncadd [#allocation3], 4294967040 }
 0x128   :  { %275 = vsyncpa [#allocation3], 1 }

</bundles_post_ra>
